<compile_context>
chip_gen: v7x
topology: tpu7x:2x2x1
jax: 0.10.0
libtpu: 0.0.40
codegen_flags: <defaults>
</compile_context>

<pallas_src>
import math

import jax
import jax.numpy as jnp
from jax import lax
from jax.experimental import pallas as pl
from jax.experimental.pallas import tpu as pltpu

_NEG_INF = float("-inf")
_HALO = 128          # halo width (one lane-tile) on each side of a length tile


def _silu(x):
    return x * jax.nn.sigmoid(x)


def _max3_sublanes(x):
    # 3-wide max along sublanes (channel axis), stride 1, -inf padding.
    # Channel subgroups are tiny (<= C/2 rows), so shifted copies are cheap;
    # XLU rolls are reserved for the wide lane axis below.
    edge = jnp.full((1, x.shape[1]), _NEG_INF, x.dtype)
    up = jnp.concatenate([x[1:, :], edge], axis=0)
    down = jnp.concatenate([edge, x[:-1, :]], axis=0)
    return jnp.maximum(x, jnp.maximum(up, down))


def _max3_lanes(x):
    # 3-wide max along lanes (length axis) via XLU rolls.  The circular wrap
    # is harmless: callers keep a 128-column halo whose pooled values are
    # never read, and -inf padding at the true sequence boundary is injected
    # by the caller's range mask; max-combining both roll directions also
    # makes the result independent of the roll sign convention.
    n = x.shape[1]
    return jnp.maximum(x, jnp.maximum(pltpu.roll(x, 1, 1),
                                      pltpu.roll(x, n - 1, 1)))


def _maxpool3x3_same(x):
    # Separable 3x3 max pool (stride 1, padding 1) over (channel, length).
    return _max3_sublanes(_max3_lanes(x))


def make_sppf_kernel(channels, split_list, channels_list, *, l_true, tl,
                     b_tile, compute_dtype):
    num_pool = len(split_list)
    assert sum(split_list) + channels_list[-1] == channels
    assert all(s > 0 for s in split_list)
    assert all(cc > 0 for cc in channels_list)
    assert num_pool < _HALO, "128-col halo must cover the pool receptive field"
    tle = tl + 2 * _HALO

    def kernel(xc_ref, xl_ref, xr_ref, w_ref, b_ref, o_ref, cat_ref):
        j = pl.program_id(1)
        w_all = w_ref[...]                               # (2C, C) compute dtype
        b_all = b_ref[...].astype(jnp.float32)           # (2C, 1) f32
        w_in, w_out = w_all[:channels, :], w_all[channels:, :]
        b_in, b_out = b_all[:channels, :], b_all[channels:, :]

        # Global column index of every extended-tile lane.  Columns outside
        # [0, l_true) act as the MaxPool2d -inf padding; masking once before
        # the pool chain is equivalent to re-padding every round.
        col = lax.broadcasted_iota(jnp.int32, (channels, tle), 1)
        g = col + (j * tl - _HALO)
        in_range = (g >= 0) & (g < l_true)

        for b in range(b_tile):     # static unroll: amortize grid-step overhead
            # in_conv: single MXU matmul + folded-BN bias + SiLU on the
            # halo-extended tile (halo columns feed only the pool chain).
            x_ext = jnp.concatenate([xl_ref[b], xc_ref[b], xr_ref[b]], axis=1)
            h = jnp.dot(w_in, x_ext, preferred_element_type=jnp.float32)
            h = _silu(h + b_in)                          # (C, TLE) f32
            h = jnp.where(in_range, h, _NEG_INF)

            # Split / 3x3 max-pool chain.  Residues (center columns only) are
            # staged into the VMEM 'cat' slab so out_conv is ONE matmul with
            # no lane-offset weight slices.
            cur = h
            row = 0
            for i in range(num_pool):
                s, ch = split_list[i], channels_list[i]
                cat_ref[row:row + s, :] = cur[:s, _HALO:_HALO + tl]
                row += s
                cur = _maxpool3x3_same(cur[s:s + ch, :])
            cat_ref[row:row + channels_list[-1], :] = cur[:, _HALO:_HALO + tl]

            # out_conv: single (C,C)x(C,TL) MXU matmul + bias + SiLU;
            # lane-dense store.
            out = jnp.dot(w_out, cat_ref[...].astype(compute_dtype),
                          preferred_element_type=jnp.float32)
            o_ref[b] = _silu(out + b_out).astype(o_ref.dtype)

    return kernel


def sppf_forward(x_ncl, w_in_f, b_in, w_out_f, b_out, split_list,
                 channels_list, *, compute_dtype=jnp.bfloat16, tl_max=1024,
                 b_tile=1):
    """SPPF forward on a PyTorch-layout NCL tensor (kernel=1, padding=0).

    compute_dtype only affects the MXU operands (x / packed weights); bias,
    SiLU, pooling and accumulation stay f32 (v5e-safe: v5e has no bf16
    VPU/EUP but its MXU is bf16-native, so bf16 is the right default on all
    generations).  If x is produced in f32, casting here costs one convert
    pass — cast at the producer when possible.
    """
    n, c, length = x_ncl.shape
    assert w_in_f.shape == (c, c) and w_out_f.shape == (c, c)

    # Length tiling: lane-dense multiples of 128, plus one 128-col halo/side.
    n128 = pl.cdiv(length, 128)
    nt = pl.cdiv(n128, max(tl_max // 128, 1))     # number of length tiles
    tlb = pl.cdiv(n128, nt)                       # 128-blocks per length tile
    tl = tlb * 128
    l_pad = nt * tl
    nb = l_pad // 128                             # total 128-blocks

    # Batch tiling: several samples per grid step for tiny per-sample slabs.
    bt = math.gcd(n, max(int(b_tile), 1))

    x_p = x_ncl
    if l_pad != length:
        x_p = jnp.pad(x_p, ((0, 0), (0, 0), (0, l_pad - length)))
    x_p = x_p.astype(compute_dtype)

    # Pack the four small parameter tensors into two slabs (one DMA each,
    # resident across the whole grid thanks to constant index maps).
    w_slab = jnp.concatenate([w_in_f, w_out_f], axis=0).astype(compute_dtype)
    b_slab = jnp.concatenate([b_in.reshape(c, 1), b_out.reshape(c, 1)],
                             axis=0).astype(jnp.float32)

    kernel = make_sppf_kernel(c, tuple(split_list), tuple(channels_list),
                              l_true=length, tl=tl, b_tile=bt,
                              compute_dtype=compute_dtype)

    out = pl.pallas_call(
        kernel,
        out_shape=jax.ShapeDtypeStruct((n, c, l_pad), x_ncl.dtype),
        grid=(n // bt, nt),
        in_specs=[
            # center length tile
            pl.BlockSpec((bt, c, tl), lambda i, j: (i, 0, j)),
            # left / right halo: neighbouring 128-column block (clamped at the
            # sequence ends; clamped duplicates are masked to -inf in-kernel).
            pl.BlockSpec((bt, c, 128),
                         lambda i, j: (i, 0, jnp.maximum(j * tlb - 1, 0))),
            pl.BlockSpec((bt, c, 128),
                         lambda i, j: (i, 0, jnp.minimum(j * tlb + tlb, nb - 1))),
            pl.BlockSpec((2 * c, c), lambda i, j: (0, 0)),    # weight slab
            pl.BlockSpec((2 * c, 1), lambda i, j: (0, 0)),    # bias slab
        ],
        out_specs=pl.BlockSpec((bt, c, tl), lambda i, j: (i, 0, j)),
        scratch_shapes=[
            # 'cat' staging slab for out_conv.  Kept f32 so the small split
            # groups store without packed-sublane masking; cast to
            # compute_dtype once at the matmul.
            pltpu.VMEM((c, tl), jnp.float32),
        ],
        compiler_params=pltpu.CompilerParams(
            dimension_semantics=("parallel", "parallel"),
            vmem_limit_bytes=32 * 1024 * 1024),
    )(x_p, x_p, x_p, w_slab, b_slab)

    return out[:, :, :length] if l_pad != length else out


def build_sppf_params(key, channels, num_maxpool, eps=1e-5):
    """Deterministic synthetic parameters with BN folded into the weights."""
    split_list, channels_list = [], []
    ch = channels
    for _ in range(num_maxpool):
        split_list.append(ch // 2)
        ch = ch - ch // 2
        channels_list.append(ch)

    def make_conv_bn(k, cin, cout):
        k1, k2, k3, k4, k5 = jax.random.split(k, 5)
        w = jax.random.normal(k1, (cout, cin), jnp.float32) * 0.1
        gamma = jax.random.uniform(k2, (cout,), jnp.float32, 0.5, 1.5)
        beta = jax.random.normal(k3, (cout,), jnp.float32) * 0.1
        rmean = jax.random.normal(k4, (cout,), jnp.float32) * 0.1
        rvar = jax.random.uniform(k5, (cout,), jnp.float32, 0.5, 1.5)
        scale = gamma / jnp.sqrt(rvar + eps)
        w_folded = w * scale[:, None]                 # BN scale folded into W
        bias = (beta - rmean * scale).reshape(cout, 1)
        return w_folded, bias

    k1, k2 = jax.random.split(key)
    w_in_f, b_in = make_conv_bn(k1, channels, channels)
    w_out_f, b_out = make_conv_bn(k2, channels, channels)
    return w_in_f, b_in, w_out_f, b_out, split_list, channels_list


def sppf_reference(x_ncl, w_in_f, b_in, w_out_f, b_out, split_list,
                   channels_list):
    """Pure-JAX reference (same eval-mode math, no Pallas)."""
    def conv_bn_silu(x, w, b):             # x: (N, C, L), w: (Cout, Cin)
        y = jnp.einsum("oc,ncl->nol", w, x) + b[None, :, :]
        return y * jax.nn.sigmoid(y)

    h = conv_bn_silu(x_ncl, w_in_f, b_in)
    residual = []
    cur = h
    for s, ch in zip(split_list, channels_list):
        residual.append(cur[:, :s, :])
        cur = lax.reduce_window(
            cur[:, s:s + ch, :], -jnp.inf, lax.max,
            window_dimensions=(1, 3, 3), window_strides=(1, 1, 1),
            padding=((0, 0), (1, 1), (1, 1)))
    residual.append(cur)
    cat = jnp.concatenate(residual, axis=1)
    return conv_bn_silu(cat, w_out_f, b_out)


if __name__ == "__main__":
    key = jax.random.PRNGKey(0)
    key, kx, kp, kx2 = jax.random.split(key, 4)

    # SPPF(channels=32, kernel=1, padding=0, num_maxpool=3) on NCL input.
    channels, num_maxpool = 32, 3
    (w_in_f, b_in, w_out_f, b_out,
     split_list, channels_list) = build_sppf_params(kp, channels, num_maxpool)

    # ---- case 1: batch=2, L=64 -> one padded 128-wide tile, 2 samples/step.
    x = jax.random.normal(kx, (2, channels, 64), jnp.float32)
    ref = sppf_reference(x, w_in_f, b_in, w_out_f, b_out,
                         split_list, channels_list)

    out = sppf_forward(x, w_in_f, b_in, w_out_f, b_out, split_list,
                       channels_list, compute_dtype=jnp.float32, b_tile=2)
    out = jax.block_until_ready(out)
    assert out.shape == x.shape
    assert jnp.allclose(out, ref, rtol=1e-4, atol=1e-4), (
        float(jnp.max(jnp.abs(out - ref))))

    # Default bf16 MXU-operand path (all generations); f32 accumulation and
    # f32 elementwise work.  Loose tolerance vs the f32 reference.
    out_bf16 = sppf_forward(x, w_in_f, b_in, w_out_f, b_out, split_list,
                            channels_list, b_tile=2)
    out_bf16 = jax.block_until_ready(out_bf16)
    assert jnp.allclose(out_bf16, ref, rtol=2e-2, atol=5e-2), (
        float(jnp.max(jnp.abs(out_bf16 - ref))))

    # ---- case 2: batch=3, L=200 with tl_max=128 -> two length tiles;
    # exercises the cross-tile halo path of the chained max pools.
    x2 = jax.random.normal(kx2, (3, channels, 200), jnp.float32)
    ref2 = sppf_reference(x2, w_in_f, b_in, w_out_f, b_out,
                          split_list, channels_list)
    out2 = sppf_forward(x2, w_in_f, b_in, w_out_f, b_out, split_list,
                        channels_list, compute_dtype=jnp.float32, tl_max=128)
    out2 = jax.block_until_ready(out2)
    assert out2.shape == x2.shape
    assert jnp.allclose(out2, ref2, rtol=1e-4, atol=1e-4), (
        float(jnp.max(jnp.abs(out2 - ref2))))

    print("KERNEL_OK")
</pallas_src>

<mosaic_0001>
module attributes {stable_mosaic.version = 11 : i64} {
  func.func @kernel(%arg0: i32, %arg1: i32, %arg2: memref<2x32x128xf32, #tpu.memory_space<vmem>>, %arg3: memref<2x32x128xf32, #tpu.memory_space<vmem>>, %arg4: memref<2x32x128xf32, #tpu.memory_space<vmem>>, %arg5: memref<64x32xf32, #tpu.memory_space<vmem>>, %arg6: memref<64x1xf32, #tpu.memory_space<vmem>>, %arg7: memref<2x32x128xf32, #tpu.memory_space<vmem>>, %arg8: memref<32x128xf32, #tpu.memory_space<vmem>>) attributes {dimension_semantics = [#tpu.dimension_semantics<parallel>, #tpu.dimension_semantics<parallel>], iteration_bounds = array<i64: 1, 1>, scalar_prefetch = 0 : i64, scratch_operands = 1 : i64, tpu.core_type = #tpu.core_type<tc>, window_params = [{transform_indices = @transform_0, window_bounds = array<i64: 2, 32, 128>}, {transform_indices = @transform_1, window_bounds = array<i64: 2, 32, 128>}, {transform_indices = @transform_2, window_bounds = array<i64: 2, 32, 128>}, {pipeline_mode = #tpu.pipeline_mode<synchronous>, transform_indices = @transform_3, window_bounds = array<i64: 64, 32>}, {pipeline_mode = #tpu.pipeline_mode<synchronous>, transform_indices = @transform_4, window_bounds = array<i64: 64, 1>}, {transform_indices = @transform_5, window_bounds = array<i64: 2, 32, 128>}]} {
    %c0 = arith.constant 0 : index
    %c0_0 = arith.constant 0 : index
    %0 = vector.load %arg5[%c0, %c0_0] : memref<64x32xf32, #tpu.memory_space<vmem>>, vector<64x32xf32>
    %c0_1 = arith.constant 0 : index
    %c0_2 = arith.constant 0 : index
    %1 = vector.load %arg6[%c0_1, %c0_2] : memref<64x1xf32, #tpu.memory_space<vmem>>, vector<64x1xf32>
    %2 = vector.extract_strided_slice %0 {offsets = [0, 0], sizes = [32, 32], strides = [1, 1]} : vector<64x32xf32> to vector<32x32xf32>
    %3 = vector.extract_strided_slice %0 {offsets = [32, 0], sizes = [32, 32], strides = [1, 1]} : vector<64x32xf32> to vector<32x32xf32>
    %4 = vector.extract_strided_slice %1 {offsets = [0, 0], sizes = [32, 1], strides = [1, 1]} : vector<64x1xf32> to vector<32x1xf32>
    %5 = vector.extract_strided_slice %1 {offsets = [32, 0], sizes = [32, 1], strides = [1, 1]} : vector<64x1xf32> to vector<32x1xf32>
    %6 = tpu.iota {dimensions = array<i32: 1>} : vector<32x384xi32>
    %c128_i32 = arith.constant 128 : i32
    %7 = arith.muli %arg1, %c128_i32 : i32
    %c128_i32_3 = arith.constant 128 : i32
    %8 = arith.subi %7, %c128_i32_3 : i32
    %9 = vector.broadcast %8 : i32 to vector<32x384xi32>
    %10 = arith.addi %6, %9 : vector<32x384xi32>
    %c0_i32 = arith.constant 0 : i32
    %11 = vector.broadcast %c0_i32 : i32 to vector<32x384xi32>
    %12 = arith.cmpi sge, %10, %11 : vector<32x384xi32>
    %c64_i32 = arith.constant 64 : i32
    %13 = vector.broadcast %c64_i32 : i32 to vector<32x384xi32>
    %14 = arith.cmpi slt, %10, %13 : vector<32x384xi32>
    %15 = arith.andi %12, %14 : vector<32x384xi1>
    %c0_4 = arith.constant 0 : index
    %c0_5 = arith.constant 0 : index
    %c0_6 = arith.constant 0 : index
    %16 = vector.load %arg3[%c0_4, %c0_5, %c0_6] : memref<2x32x128xf32, #tpu.memory_space<vmem>>, vector<1x32x128xf32>
    %17 = vector.shape_cast %16 : vector<1x32x128xf32> to vector<32x128xf32>
    %c0_7 = arith.constant 0 : index
    %c0_8 = arith.constant 0 : index
    %c0_9 = arith.constant 0 : index
    %18 = vector.load %arg2[%c0_7, %c0_8, %c0_9] : memref<2x32x128xf32, #tpu.memory_space<vmem>>, vector<1x32x128xf32>
    %19 = vector.shape_cast %18 : vector<1x32x128xf32> to vector<32x128xf32>
    %c0_10 = arith.constant 0 : index
    %c0_11 = arith.constant 0 : index
    %c0_12 = arith.constant 0 : index
    %20 = vector.load %arg4[%c0_10, %c0_11, %c0_12] : memref<2x32x128xf32, #tpu.memory_space<vmem>>, vector<1x32x128xf32>
    %21 = vector.shape_cast %20 : vector<1x32x128xf32> to vector<32x128xf32>
    %22 = tpu.concatenate %17, %19, %21 in 1 : vector<32x128xf32>, vector<32x128xf32>, vector<32x128xf32> -> vector<32x384xf32>
    %cst = arith.constant dense<0.000000e+00> : vector<32x384xf32>
    %23 = tpu.matmul %2, %22, %cst {dimension_numbers = #tpu.dot_dimension_numbers<[1], [0], [0], [1], [0, 0, 1, 1], [], []>} : vector<32x32xf32>, vector<32x384xf32>, vector<32x384xf32> -> vector<32x384xf32>
    %24 = vector.broadcast %4 : vector<32x1xf32> to vector<32x384xf32>
    %25 = arith.addf %23, %24 : vector<32x384xf32>
    %26 = arith.negf %25 : vector<32x384xf32>
    %27 = math.exp %26 : vector<32x384xf32>
    %cst_13 = arith.constant 1.000000e+00 : f32
    %28 = vector.broadcast %cst_13 : f32 to vector<32x384xf32>
    %29 = arith.addf %28, %27 : vector<32x384xf32>
    %30 = arith.divf %28, %29 : vector<32x384xf32>
    %31 = arith.mulf %25, %30 : vector<32x384xf32>
    %cst_14 = arith.constant 0xFF800000 : f32
    %32 = vector.broadcast %cst_14 : f32 to vector<32x384xf32>
    %33 = arith.select %15, %31, %32 : vector<32x384xi1>, vector<32x384xf32>
    %34 = vector.extract_strided_slice %33 {offsets = [0, 128], sizes = [16, 128], strides = [1, 1]} : vector<32x384xf32> to vector<16x128xf32>
    %c0_15 = arith.constant 0 : index
    %c0_16 = arith.constant 0 : index
    %35 = vector.load %arg8[%c0_15, %c0_16] : memref<32x128xf32, #tpu.memory_space<vmem>>, vector<16x128xf32>
    tpu.vector_store %arg8[%c0_15, %c0_16], %34 {strides = array<i32>} : memref<32x128xf32, #tpu.memory_space<vmem>>, vector<16x128xf32>,
    %36 = vector.extract_strided_slice %33 {offsets = [16, 0], sizes = [16, 384], strides = [1, 1]} : vector<32x384xf32> to vector<16x384xf32>
    %c1_i32 = arith.constant 1 : i32
    %37 = tpu.dynamic_rotate %36 by %c1_i32 dim 1 : vector<16x384xf32>, i32 -> vector<16x384xf32>
    %c383_i32 = arith.constant 383 : i32
    %38 = tpu.dynamic_rotate %36 by %c383_i32 dim 1 : vector<16x384xf32>, i32 -> vector<16x384xf32>
    %39 = arith.maximumf %37, %38 : vector<16x384xf32>
    %40 = arith.maximumf %36, %39 : vector<16x384xf32>
    %cst_17 = arith.constant 0xFF800000 : f32
    %41 = vector.broadcast %cst_17 : f32 to vector<1x384xf32>
    %42 = vector.extract_strided_slice %40 {offsets = [1, 0], sizes = [15, 384], strides = [1, 1]} : vector<16x384xf32> to vector<15x384xf32>
    %43 = tpu.concatenate %42, %41 in 0 : vector<15x384xf32>, vector<1x384xf32> -> vector<16x384xf32>
    %44 = vector.extract_strided_slice %40 {offsets = [0, 0], sizes = [15, 384], strides = [1, 1]} : vector<16x384xf32> to vector<15x384xf32>
    %45 = tpu.concatenate %41, %44 in 0 : vector<1x384xf32>, vector<15x384xf32> -> vector<16x384xf32>
    %46 = arith.maximumf %43, %45 : vector<16x384xf32>
    %47 = arith.maximumf %40, %46 : vector<16x384xf32>
    %48 = vector.extract_strided_slice %47 {offsets = [0, 128], sizes = [8, 128], strides = [1, 1]} : vector<16x384xf32> to vector<8x128xf32>
    %c16 = arith.constant 16 : index
    %c0_18 = arith.constant 0 : index
    %49 = vector.load %arg8[%c16, %c0_18] : memref<32x128xf32, #tpu.memory_space<vmem>>, vector<8x128xf32>
    tpu.vector_store %arg8[%c16, %c0_18], %48 {strides = array<i32>} : memref<32x128xf32, #tpu.memory_space<vmem>>, vector<8x128xf32>,
    %50 = vector.extract_strided_slice %47 {offsets = [8, 0], sizes = [8, 384], strides = [1, 1]} : vector<16x384xf32> to vector<8x384xf32>
    %c1_i32_19 = arith.constant 1 : i32
    %51 = tpu.dynamic_rotate %50 by %c1_i32_19 dim 1 : vector<8x384xf32>, i32 -> vector<8x384xf32>
    %c383_i32_20 = arith.constant 383 : i32
    %52 = tpu.dynamic_rotate %50 by %c383_i32_20 dim 1 : vector<8x384xf32>, i32 -> vector<8x384xf32>
    %53 = arith.maximumf %51, %52 : vector<8x384xf32>
    %54 = arith.maximumf %50, %53 : vector<8x384xf32>
    %cst_21 = arith.constant 0xFF800000 : f32
    %55 = vector.broadcast %cst_21 : f32 to vector<1x384xf32>
    %56 = vector.extract_strided_slice %54 {offsets = [1, 0], sizes = [7, 384], strides = [1, 1]} : vector<8x384xf32> to vector<7x384xf32>
    %57 = tpu.concatenate %56, %55 in 0 : vector<7x384xf32>, vector<1x384xf32> -> vector<8x384xf32>
    %58 = vector.extract_strided_slice %54 {offsets = [0, 0], sizes = [7, 384], strides = [1, 1]} : vector<8x384xf32> to vector<7x384xf32>
    %59 = tpu.concatenate %55, %58 in 0 : vector<1x384xf32>, vector<7x384xf32> -> vector<8x384xf32>
    %60 = arith.maximumf %57, %59 : vector<8x384xf32>
    %61 = arith.maximumf %54, %60 : vector<8x384xf32>
    %62 = vector.extract_strided_slice %61 {offsets = [0, 128], sizes = [4, 128], strides = [1, 1]} : vector<8x384xf32> to vector<4x128xf32>
    %c24 = arith.constant 24 : index
    %c0_22 = arith.constant 0 : index
    %63 = vector.load %arg8[%c24, %c0_22] : memref<32x128xf32, #tpu.memory_space<vmem>>, vector<4x128xf32>
    tpu.vector_store %arg8[%c24, %c0_22], %62 {strides = array<i32>} : memref<32x128xf32, #tpu.memory_space<vmem>>, vector<4x128xf32>,
    %64 = vector.extract_strided_slice %61 {offsets = [4, 0], sizes = [4, 384], strides = [1, 1]} : vector<8x384xf32> to vector<4x384xf32>
    %c1_i32_23 = arith.constant 1 : i32
    %65 = tpu.dynamic_rotate %64 by %c1_i32_23 dim 1 : vector<4x384xf32>, i32 -> vector<4x384xf32>
    %c383_i32_24 = arith.constant 383 : i32
    %66 = tpu.dynamic_rotate %64 by %c383_i32_24 dim 1 : vector<4x384xf32>, i32 -> vector<4x384xf32>
    %67 = arith.maximumf %65, %66 : vector<4x384xf32>
    %68 = arith.maximumf %64, %67 : vector<4x384xf32>
    %cst_25 = arith.constant 0xFF800000 : f32
    %69 = vector.broadcast %cst_25 : f32 to vector<1x384xf32>
    %70 = vector.extract_strided_slice %68 {offsets = [1, 0], sizes = [3, 384], strides = [1, 1]} : vector<4x384xf32> to vector<3x384xf32>
    %71 = tpu.concatenate %70, %69 in 0 : vector<3x384xf32>, vector<1x384xf32> -> vector<4x384xf32>
    %72 = vector.extract_strided_slice %68 {offsets = [0, 0], sizes = [3, 384], strides = [1, 1]} : vector<4x384xf32> to vector<3x384xf32>
    %73 = tpu.concatenate %69, %72 in 0 : vector<1x384xf32>, vector<3x384xf32> -> vector<4x384xf32>
    %74 = arith.maximumf %71, %73 : vector<4x384xf32>
    %75 = arith.maximumf %68, %74 : vector<4x384xf32>
    %76 = vector.extract_strided_slice %75 {offsets = [0, 128], sizes = [4, 128], strides = [1, 1]} : vector<4x384xf32> to vector<4x128xf32>
    %c28 = arith.constant 28 : index
    %c0_26 = arith.constant 0 : index
    %77 = vector.load %arg8[%c28, %c0_26] : memref<32x128xf32, #tpu.memory_space<vmem>>, vector<4x128xf32>
    tpu.vector_store %arg8[%c28, %c0_26], %76 {strides = array<i32>} : memref<32x128xf32, #tpu.memory_space<vmem>>, vector<4x128xf32>,
    %c0_27 = arith.constant 0 : index
    %c0_28 = arith.constant 0 : index
    %78 = vector.load %arg8[%c0_27, %c0_28] : memref<32x128xf32, #tpu.memory_space<vmem>>, vector<32x128xf32>
    %cst_29 = arith.constant dense<0.000000e+00> : vector<32x128xf32>
    %79 = tpu.matmul %3, %78, %cst_29 {dimension_numbers = #tpu.dot_dimension_numbers<[1], [0], [0], [1], [0, 0, 1, 1], [], []>} : vector<32x32xf32>, vector<32x128xf32>, vector<32x128xf32> -> vector<32x128xf32>
    %80 = vector.broadcast %5 : vector<32x1xf32> to vector<32x128xf32>
    %81 = arith.addf %79, %80 : vector<32x128xf32>
    %82 = arith.negf %81 : vector<32x128xf32>
    %83 = math.exp %82 : vector<32x128xf32>
    %cst_30 = arith.constant 1.000000e+00 : f32
    %84 = vector.broadcast %cst_30 : f32 to vector<32x128xf32>
    %85 = arith.addf %84, %83 : vector<32x128xf32>
    %86 = arith.divf %84, %85 : vector<32x128xf32>
    %87 = arith.mulf %81, %86 : vector<32x128xf32>
    %c0_31 = arith.constant 0 : index
    %c0_32 = arith.constant 0 : index
    %c0_33 = arith.constant 0 : index
    %88 = vector.load %arg7[%c0_31, %c0_32, %c0_33] : memref<2x32x128xf32, #tpu.memory_space<vmem>>, vector<1x32x128xf32>
    %89 = vector.shape_cast %88 : vector<1x32x128xf32> to vector<32x128xf32>
    %90 = vector.shape_cast %87 : vector<32x128xf32> to vector<1x32x128xf32>
    tpu.vector_store %arg7[%c0_31, %c0_32, %c0_33], %90 {strides = array<i32>} : memref<2x32x128xf32, #tpu.memory_space<vmem>>, vector<1x32x128xf32>,
    %c1 = arith.constant 1 : index
    %c0_34 = arith.constant 0 : index
    %c0_35 = arith.constant 0 : index
    %91 = vector.load %arg3[%c1, %c0_34, %c0_35] : memref<2x32x128xf32, #tpu.memory_space<vmem>>, vector<1x32x128xf32>
    %92 = vector.shape_cast %91 : vector<1x32x128xf32> to vector<32x128xf32>
    %c1_36 = arith.constant 1 : index
    %c0_37 = arith.constant 0 : index
    %c0_38 = arith.constant 0 : index
    %93 = vector.load %arg2[%c1_36, %c0_37, %c0_38] : memref<2x32x128xf32, #tpu.memory_space<vmem>>, vector<1x32x128xf32>
    %94 = vector.shape_cast %93 : vector<1x32x128xf32> to vector<32x128xf32>
    %c1_39 = arith.constant 1 : index
    %c0_40 = arith.constant 0 : index
    %c0_41 = arith.constant 0 : index
    %95 = vector.load %arg4[%c1_39, %c0_40, %c0_41] : memref<2x32x128xf32, #tpu.memory_space<vmem>>, vector<1x32x128xf32>
    %96 = vector.shape_cast %95 : vector<1x32x128xf32> to vector<32x128xf32>
    %97 = tpu.concatenate %92, %94, %96 in 1 : vector<32x128xf32>, vector<32x128xf32>, vector<32x128xf32> -> vector<32x384xf32>
    %cst_42 = arith.constant dense<0.000000e+00> : vector<32x384xf32>
    %98 = tpu.matmul %2, %97, %cst_42 {dimension_numbers = #tpu.dot_dimension_numbers<[1], [0], [0], [1], [0, 0, 1, 1], [], []>} : vector<32x32xf32>, vector<32x384xf32>, vector<32x384xf32> -> vector<32x384xf32>
    %99 = vector.broadcast %4 : vector<32x1xf32> to vector<32x384xf32>
    %100 = arith.addf %98, %99 : vector<32x384xf32>
    %101 = arith.negf %100 : vector<32x384xf32>
    %102 = math.exp %101 : vector<32x384xf32>
    %cst_43 = arith.constant 1.000000e+00 : f32
    %103 = vector.broadcast %cst_43 : f32 to vector<32x384xf32>
    %104 = arith.addf %103, %102 : vector<32x384xf32>
    %105 = arith.divf %103, %104 : vector<32x384xf32>
    %106 = arith.mulf %100, %105 : vector<32x384xf32>
    %cst_44 = arith.constant 0xFF800000 : f32
    %107 = vector.broadcast %cst_44 : f32 to vector<32x384xf32>
    %108 = arith.select %15, %106, %107 : vector<32x384xi1>, vector<32x384xf32>
    %109 = vector.extract_strided_slice %108 {offsets = [0, 128], sizes = [16, 128], strides = [1, 1]} : vector<32x384xf32> to vector<16x128xf32>
    %c0_45 = arith.constant 0 : index
    %c0_46 = arith.constant 0 : index
    %110 = vector.load %arg8[%c0_45, %c0_46] : memref<32x128xf32, #tpu.memory_space<vmem>>, vector<16x128xf32>
    tpu.vector_store %arg8[%c0_45, %c0_46], %109 {strides = array<i32>} : memref<32x128xf32, #tpu.memory_space<vmem>>, vector<16x128xf32>,
    %111 = vector.extract_strided_slice %108 {offsets = [16, 0], sizes = [16, 384], strides = [1, 1]} : vector<32x384xf32> to vector<16x384xf32>
    %c1_i32_47 = arith.constant 1 : i32
    %112 = tpu.dynamic_rotate %111 by %c1_i32_47 dim 1 : vector<16x384xf32>, i32 -> vector<16x384xf32>
    %c383_i32_48 = arith.constant 383 : i32
    %113 = tpu.dynamic_rotate %111 by %c383_i32_48 dim 1 : vector<16x384xf32>, i32 -> vector<16x384xf32>
    %114 = arith.maximumf %112, %113 : vector<16x384xf32>
    %115 = arith.maximumf %111, %114 : vector<16x384xf32>
    %cst_49 = arith.constant 0xFF800000 : f32
    %116 = vector.broadcast %cst_49 : f32 to vector<1x384xf32>
    %117 = vector.extract_strided_slice %115 {offsets = [1, 0], sizes = [15, 384], strides = [1, 1]} : vector<16x384xf32> to vector<15x384xf32>
    %118 = tpu.concatenate %117, %116 in 0 : vector<15x384xf32>, vector<1x384xf32> -> vector<16x384xf32>
    %119 = vector.extract_strided_slice %115 {offsets = [0, 0], sizes = [15, 384], strides = [1, 1]} : vector<16x384xf32> to vector<15x384xf32>
    %120 = tpu.concatenate %116, %119 in 0 : vector<1x384xf32>, vector<15x384xf32> -> vector<16x384xf32>
    %121 = arith.maximumf %118, %120 : vector<16x384xf32>
    %122 = arith.maximumf %115, %121 : vector<16x384xf32>
    %123 = vector.extract_strided_slice %122 {offsets = [0, 128], sizes = [8, 128], strides = [1, 1]} : vector<16x384xf32> to vector<8x128xf32>
    %c16_50 = arith.constant 16 : index
    %c0_51 = arith.constant 0 : index
    %124 = vector.load %arg8[%c16_50, %c0_51] : memref<32x128xf32, #tpu.memory_space<vmem>>, vector<8x128xf32>
    tpu.vector_store %arg8[%c16_50, %c0_51], %123 {strides = array<i32>} : memref<32x128xf32, #tpu.memory_space<vmem>>, vector<8x128xf32>,
    %125 = vector.extract_strided_slice %122 {offsets = [8, 0], sizes = [8, 384], strides = [1, 1]} : vector<16x384xf32> to vector<8x384xf32>
    %c1_i32_52 = arith.constant 1 : i32
    %126 = tpu.dynamic_rotate %125 by %c1_i32_52 dim 1 : vector<8x384xf32>, i32 -> vector<8x384xf32>
    %c383_i32_53 = arith.constant 383 : i32
    %127 = tpu.dynamic_rotate %125 by %c383_i32_53 dim 1 : vector<8x384xf32>, i32 -> vector<8x384xf32>
    %128 = arith.maximumf %126, %127 : vector<8x384xf32>
    %129 = arith.maximumf %125, %128 : vector<8x384xf32>
    %cst_54 = arith.constant 0xFF800000 : f32
    %130 = vector.broadcast %cst_54 : f32 to vector<1x384xf32>
    %131 = vector.extract_strided_slice %129 {offsets = [1, 0], sizes = [7, 384], strides = [1, 1]} : vector<8x384xf32> to vector<7x384xf32>
    %132 = tpu.concatenate %131, %130 in 0 : vector<7x384xf32>, vector<1x384xf32> -> vector<8x384xf32>
    %133 = vector.extract_strided_slice %129 {offsets = [0, 0], sizes = [7, 384], strides = [1, 1]} : vector<8x384xf32> to vector<7x384xf32>
    %134 = tpu.concatenate %130, %133 in 0 : vector<1x384xf32>, vector<7x384xf32> -> vector<8x384xf32>
    %135 = arith.maximumf %132, %134 : vector<8x384xf32>
    %136 = arith.maximumf %129, %135 : vector<8x384xf32>
    %137 = vector.extract_strided_slice %136 {offsets = [0, 128], sizes = [4, 128], strides = [1, 1]} : vector<8x384xf32> to vector<4x128xf32>
    %c24_55 = arith.constant 24 : index
    %c0_56 = arith.constant 0 : index
    %138 = vector.load %arg8[%c24_55, %c0_56] : memref<32x128xf32, #tpu.memory_space<vmem>>, vector<4x128xf32>
    tpu.vector_store %arg8[%c24_55, %c0_56], %137 {strides = array<i32>} : memref<32x128xf32, #tpu.memory_space<vmem>>, vector<4x128xf32>,
    %139 = vector.extract_strided_slice %136 {offsets = [4, 0], sizes = [4, 384], strides = [1, 1]} : vector<8x384xf32> to vector<4x384xf32>
    %c1_i32_57 = arith.constant 1 : i32
    %140 = tpu.dynamic_rotate %139 by %c1_i32_57 dim 1 : vector<4x384xf32>, i32 -> vector<4x384xf32>
    %c383_i32_58 = arith.constant 383 : i32
    %141 = tpu.dynamic_rotate %139 by %c383_i32_58 dim 1 : vector<4x384xf32>, i32 -> vector<4x384xf32>
    %142 = arith.maximumf %140, %141 : vector<4x384xf32>
    %143 = arith.maximumf %139, %142 : vector<4x384xf32>
    %cst_59 = arith.constant 0xFF800000 : f32
    %144 = vector.broadcast %cst_59 : f32 to vector<1x384xf32>
    %145 = vector.extract_strided_slice %143 {offsets = [1, 0], sizes = [3, 384], strides = [1, 1]} : vector<4x384xf32> to vector<3x384xf32>
    %146 = tpu.concatenate %145, %144 in 0 : vector<3x384xf32>, vector<1x384xf32> -> vector<4x384xf32>
    %147 = vector.extract_strided_slice %143 {offsets = [0, 0], sizes = [3, 384], strides = [1, 1]} : vector<4x384xf32> to vector<3x384xf32>
    %148 = tpu.concatenate %144, %147 in 0 : vector<1x384xf32>, vector<3x384xf32> -> vector<4x384xf32>
    %149 = arith.maximumf %146, %148 : vector<4x384xf32>
    %150 = arith.maximumf %143, %149 : vector<4x384xf32>
    %151 = vector.extract_strided_slice %150 {offsets = [0, 128], sizes = [4, 128], strides = [1, 1]} : vector<4x384xf32> to vector<4x128xf32>
    %c28_60 = arith.constant 28 : index
    %c0_61 = arith.constant 0 : index
    %152 = vector.load %arg8[%c28_60, %c0_61] : memref<32x128xf32, #tpu.memory_space<vmem>>, vector<4x128xf32>
    tpu.vector_store %arg8[%c28_60, %c0_61], %151 {strides = array<i32>} : memref<32x128xf32, #tpu.memory_space<vmem>>, vector<4x128xf32>,
    %c0_62 = arith.constant 0 : index
    %c0_63 = arith.constant 0 : index
    %153 = vector.load %arg8[%c0_62, %c0_63] : memref<32x128xf32, #tpu.memory_space<vmem>>, vector<32x128xf32>
    %cst_64 = arith.constant dense<0.000000e+00> : vector<32x128xf32>
    %154 = tpu.matmul %3, %153, %cst_64 {dimension_numbers = #tpu.dot_dimension_numbers<[1], [0], [0], [1], [0, 0, 1, 1], [], []>} : vector<32x32xf32>, vector<32x128xf32>, vector<32x128xf32> -> vector<32x128xf32>
    %155 = vector.broadcast %5 : vector<32x1xf32> to vector<32x128xf32>
    %156 = arith.addf %154, %155 : vector<32x128xf32>
    %157 = arith.negf %156 : vector<32x128xf32>
    %158 = math.exp %157 : vector<32x128xf32>
    %cst_65 = arith.constant 1.000000e+00 : f32
    %159 = vector.broadcast %cst_65 : f32 to vector<32x128xf32>
    %160 = arith.addf %159, %158 : vector<32x128xf32>
    %161 = arith.divf %159, %160 : vector<32x128xf32>
    %162 = arith.mulf %156, %161 : vector<32x128xf32>
    %c1_66 = arith.constant 1 : index
    %c0_67 = arith.constant 0 : index
    %c0_68 = arith.constant 0 : index
    %163 = vector.load %arg7[%c1_66, %c0_67, %c0_68] : memref<2x32x128xf32, #tpu.memory_space<vmem>>, vector<1x32x128xf32>
    %164 = vector.shape_cast %163 : vector<1x32x128xf32> to vector<32x128xf32>
    %165 = vector.shape_cast %162 : vector<32x128xf32> to vector<1x32x128xf32>
    tpu.vector_store %arg7[%c1_66, %c0_67, %c0_68], %165 {strides = array<i32>} : memref<2x32x128xf32, #tpu.memory_space<vmem>>, vector<1x32x128xf32>,
    return
  }
  func.func @transform_0(%arg0: i32, %arg1: i32) -> (i32, i32, i32) {
    %c0_i32 = arith.constant 0 : i32
    %c0_i32_0 = arith.constant 0 : i32
    return %arg0, %c0_i32, %arg1 : i32, i32, i32
  }
  func.func @transform_1(%arg0: i32, %arg1: i32) -> (i32, i32, i32) {
    %c1_i32 = arith.constant 1 : i32
    %0 = arith.muli %arg1, %c1_i32 : i32
    %c1_i32_0 = arith.constant 1 : i32
    %1 = arith.subi %0, %c1_i32_0 : i32
    %c0_i32 = arith.constant 0 : i32
    %2 = arith.maxsi %1, %c0_i32 : i32
    %c0_i32_1 = arith.constant 0 : i32
    %c0_i32_2 = arith.constant 0 : i32
    return %arg0, %c0_i32_1, %2 : i32, i32, i32
  }
  func.func @transform_2(%arg0: i32, %arg1: i32) -> (i32, i32, i32) {
    %c1_i32 = arith.constant 1 : i32
    %0 = arith.muli %arg1, %c1_i32 : i32
    %c1_i32_0 = arith.constant 1 : i32
    %1 = arith.addi %0, %c1_i32_0 : i32
    %c0_i32 = arith.constant 0 : i32
    %2 = arith.minsi %1, %c0_i32 : i32
    %c0_i32_1 = arith.constant 0 : i32
    %c0_i32_2 = arith.constant 0 : i32
    return %arg0, %c0_i32_1, %2 : i32, i32, i32
  }
  func.func @transform_3(%arg0: i32, %arg1: i32) -> (i32, i32) {
    %c0_i32 = arith.constant 0 : i32
    %c0_i32_0 = arith.constant 0 : i32
    %c0_i32_1 = arith.constant 0 : i32
    return %c0_i32, %c0_i32_0 : i32, i32
  }
  func.func @transform_4(%arg0: i32, %arg1: i32) -> (i32, i32) {
    %c0_i32 = arith.constant 0 : i32
    %c0_i32_0 = arith.constant 0 : i32
    %c0_i32_1 = arith.constant 0 : i32
    return %c0_i32, %c0_i32_0 : i32, i32
  }
  func.func @transform_5(%arg0: i32, %arg1: i32) -> (i32, i32, i32) {
    %c0_i32 = arith.constant 0 : i32
    %c0_i32_0 = arith.constant 0 : i32
    return %arg0, %c0_i32, %arg1 : i32, i32, i32
  }
}

</mosaic_0001>

<bundles_post_ra>
// kernel: tpu_custom_call.1
= control target key start
LH: loop header
LB: loop body
LE: loop exit
PB: predicated region body
PF: predicated region fallthrough
CT: control target
= control target key end

     0   :  { %10 = vsyncpa [#allocation4], 0  ;;  %s2126_s0 = inlined_call_operand.vmem [shape: f32[2,32,128], index: 0, kind: input, shape index: {}]   ;;  %s2127_s1 = inlined_call_operand.vmem [shape: f32[2,32,128], index: 1, kind: input, shape index: {}]   ;;  %s2128_s2 = inlined_call_operand.hbm [shape: f32[2,32,128], index: 2, kind: input, shape index: {}]   ;;  %s2129_s3 = inlined_call_operand.vmem [shape: f32[64,32], index: 3, kind: input, shape index: {}]   ;;  %s2130_s4 = inlined_call_operand.vmem [shape: f32[64,1], index: 4, kind: input, shape index: {}]   ;;  %s2131_s5 = inlined_call_operand.hbm [shape: f32[2,32,128], index: 5, kind: output, shape index: {}]  }
   0x1   :  { %11 = vsyncpa [#allocation5], 0  ;;  %s1653_s18 = smov [#allocation3]   ;;  %s1605_s22 = scalar_lea.hbm %s2128_s2, 1024 }
   0x2   :  { %s36_s19 = sshll.u32 %s1653_s18, 4  ;;  %p1606_p0 = scmp.ne.s32.totalorder %s2128_s2, %s1605_s22  ;;  %s37_s19 = int_to_ptr.vmem [resolvable:$true] %s36_s19 }
   0x3   :  { %p1609_p1 = scmp.lt.u32.totalorder %s1605_s22, %s2128_s2 }
   0x5   :  { %p1611_p2 = pnand %p1609_p1, %p1606_p0 }
   0x7   :  { %1614 = shalt.err (!%p1611_p2)
}
   0x8   :  { %s1615_s27 = scalar_lea.vmem %s37_s19, 1024  ;;  %p1620_p4 = scmp.lt.s32.totalorder %s37_s19, %s37_s19 }
   0x9   :  { %p1616_p3 = scmp.ne.s32.totalorder %s37_s19, %s1615_s27  ;;  %p1621_p5 = scmp.lt.s32.totalorder %s1615_s27, %s1615_s27 }
   0xb   :  { %p1622_p6 = por %p1621_p5, %p1620_p4 }
   0xd   :  { %p1623_p7 = pnand %p1622_p6, %p1616_p3 }
   0xf   :  { %1626 = shalt.err (!%p1623_p7)
}
  0x10   :  { %s1654_s28 = smov 128   ;;  %s1655_s29 = smov 8  }
  0x11   :  { %42 = dma.hbm_to_vmem [thread:$0]  %s2128_s2, 1024, %s37_s19, [#allocation4], %s1654_s28, %s1654_s28, %s1655_s29  }
  0x12   :  { %1649 = dma.done.wait [#allocation4], 1024  }
  0x13   :  { %1650 = vsyncadd [#allocation4], 4294966272  ;;  %v1656_v0 = vmov 0.0   ;;  %v1657_v1 = vmov 0   ;;  %v109_v2 = vld [vmem:[%s2126_s0] sm:$0xff]  ;;  %v110_v3 = vld [vmem:[%s2126_s0 + $0x8] sm:$0xff]  ;;  %v86_v51 = vlaneseq }
  0x14   :  { %214 = vmatprep.mubr.f32.mxu0 %v1656_v0  ;;  %1499 = vset.pattern.permute.xlu0 %v1657_v1  ;;  %v105_v4 = vld [vmem:[%s2127_s1] sm:$0xff]  ;;  %v1442_v5 = vpack.c.bf16 %v110_v3, %v109_v2  ;;  %v106_v6 = vld [vmem:[%s2127_s1 + $0x8] sm:$0xff]  ;;  %v111_v7 = vld [vmem:[%s2126_s0 + $0x10] sm:$0xff]  ;;  %vm137_vm0 = vcmask 261120   ;;  %v1658_v32 = vmov -inf|-inf  }
  0x15   :  { %1540 = vset.pattern.permute.xlu1 %v1657_v1  ;;  %v112_v8 = vld [vmem:[%s2126_s0 + $0x18] sm:$0xff]  ;;  %v1444_v9 = vpack.c.bf16 %v106_v6, %v105_v4  ;;  %v107_v11 = vld [vmem:[%s2127_s1 + $0x10] sm:$0xff]  ;;  %v1734_v13 = vld [vmem:[%s2129_s3] sm:$0xff]  ;;  %s1659_s24 = smov 1   ;;  %s1660_s25 = smov 127   ;;  %v1811_v56 = vand.u32 127, %v86_v51 }
  0x16   :  { %v1446_v10 = vpack.c.bf16 %v112_v8, %v111_v7  ;;  %v108_v12 = vld [vmem:[%s2127_s1 + $0x18] sm:$0xff]  ;;  %1443 = vmatprep.subr.bf16.mxu0 %v1442_v5  ;;  %v1326_v14 = vld [vmem:[%s2126_s0 + $0x20] sm:$0xff]  ;;  %v1327_v15 = vld [vmem:[%s2126_s0 + $0x28] sm:$0xff]  ;;  %1394 = vmatprep.mubr.msk.f32.mxu1 %vm137_vm0, %v1734_v13  ;;  %vm455_vm4 = vcmask 1040384   ;;  %vm440_vm5 = vcmask 1046528   ;;  %vm558_vm6 = vcmask 1042432  }
  0x17   :  { %1445 = vmatpush1.bf16.msra.mxu0 %v1444_v9  ;;  %v1448_v16 = vpack.c.bf16 %v108_v12, %v107_v11  ;;  %v1466_v17 = vpack.c.bf16 %v1327_v15, %v1326_v14  ;;  %v1322_v18 = vld [vmem:[%s2127_s1 + $0x20] sm:$0xff]  ;;  %v1323_v19 = vld [vmem:[%s2127_s1 + $0x28] sm:$0xff]  ;;  %v1328_v20 = vld [vmem:[%s2126_s0 + $0x30] sm:$0xff]  ;;  %1501 = vrot.lane.b32.xlu1 %v1658_v32, %s1659_s24  ;;  %v88_v63 = vadd.s32 128, %v1811_v56  ;;  %vm398_vm2 = vcmp.lt.s32.totalorder %v1811_v56, 1 }
  0x18   :  { %1447 = vmatprep.subr.bf16.mxu0 %v1446_v10  ;;  %v1329_v21 = vld [vmem:[%s2126_s0 + $0x38] sm:$0xff]  ;;  %v80_v22 = vld [vmem:[%s2130_s4 + $0x10] sm:$0xff]  ;;  %v1468_v23 = vpack.c.bf16 %v1323_v19, %v1322_v18  ;;  %v1773_v28 = vld [vmem:[%s2129_s3 + $0x8] sm:$0xff]  ;;  %vm417_vm3 = vcmp.lt.s32.totalorder %v1811_v56, 127 }
  0x19   :  { %129 = vperm.xlu0 %1499, %v80_v22   ;;  %v81_v24 = vld [vmem:[%s2130_s4 + $0x18] sm:$0xff]  ;;  %v1470_v25 = vpack.c.bf16 %v1329_v21, %v1328_v20  ;;  %v1324_v26 = vld [vmem:[%s2127_s1 + $0x30] sm:$0xff]  ;;  %v1814_v2 = vadd.s32 4294967168, %v88_v63 }
  0x1a   :  { %v1325_v27 = vld [vmem:[%s2127_s1 + $0x38] sm:$0xff]  ;;  %v1780_v30 = vld [vmem:[%s2129_s3 + $0x10] sm:$0xff] }
  0x1b   :  { %1449 = vmatpush1.bf16.msra.mxu0 %v1448_v16  ;;  %v1472_v29 = vpack.c.bf16 %v1325_v27, %v1324_v26  ;;  %v1787_v31 = vld [vmem:[%s2129_s3 + $0x18] sm:$0xff]  ;;  %1506 = vrot.lane.b32.xlu1 %v1658_v32, %s1660_s25  ;;  %vm100_vm1 = vcmp.lt.s32.totalorder %v1814_v2, 64 }
  0x1c   :  { %1467 = vmatprep.subr.bf16.mxu0 %v1466_v17 }
  0x1d   :  { %134 = vperm.xlu0 %1499, %v81_v24  }
  0x1e   :  { %1298 = vmatmul.mubr.msk.f32.vlgmr.msra.gmra.mrb[0].mxu0 %vm137_vm0, %v1734_v13 }
  0x1f   :  { %1469 = vmatpush1.bf16.msra.mxu0 %v1468_v23  ;;  %219 = vmatprep.mubr.f32.mxu0 %v1656_v0 }
  0x20   :  { %1471 = vmatprep.subr.bf16.mxu0 %v1470_v25 }
  0x22   :  { %1299 = vmatmul.mubr.msk.f32.gmra.mrb[2].mxu0 %vm137_vm0, %v1773_v28 }
  0x23   :  { %224 = vmatprep.mubr.f32.mxu0 %v1656_v0  ;;  %1473 = vmatpush1.bf16.msra.mxu0 %v1472_v29 }
  0x26   :  { %1300 = vmatmul.mubr.msk.f32.gmra.mrb[4].mxu0 %vm137_vm0, %v1780_v30 }
  0x27   :  { %230 = vmatprep.mubr.f32.mxu0 %v1656_v0 }
  0x2a   :  { %1301 = vmatmul.mubr.msk.f32.gmra.mrb[6].mxu0 %vm137_vm0, %v1787_v31 }
  0x2b   :  { %801 = vmatprep.mubr.f32.mxu0 %v1656_v0 }
  0x2e   :  { %1330 = vmatmul.mubr.msk.f32.vlgmr.msra.gmra.mrb[8].mxu0 %vm137_vm0, %v1734_v13 }
  0x2f   :  { %806 = vmatprep.mubr.f32.mxu0 %v1656_v0 }
  0x32   :  { %1331 = vmatmul.mubr.msk.f32.gmra.mrb[10].mxu0 %vm137_vm0, %v1773_v28 }
  0x33   :  { %811 = vmatprep.mubr.f32.mxu0 %v1656_v0 }
  0x36   :  { %1332 = vmatmul.mubr.msk.f32.gmra.mrb[12].mxu0 %vm137_vm0, %v1780_v30 }
  0x37   :  { %817 = vmatprep.mubr.f32.mxu0 %v1656_v0 }
  0x3a   :  { %1333 = vmatmul.mubr.msk.f32.gmra.mrb[14].mxu0 %vm137_vm0, %v1787_v31 }
  0x89   :  { %v1502_v20 = vpop.permute.xlu1 %1501 }
  0x8a   :  { %v1503_v23 = vunpack.i.l.bf16 %v1502_v20 }
  0x8d   :  { %v1507_v21 = vpop.permute.xlu1 %1506 }
  0x8e   :  { %v1508_v24 = vunpack.i.l.bf16 %v1507_v21 }
  0x98   :  { %v130_v37 = vpop.permute.xlu0 %129 }
  0x9c   :  { %v135_v43 = vpop.permute.xlu0 %134 }
  0xf1   :  { %v216_v33 = vpop.f32.mrb[0].mxu0 }
  0xf2   :  { %v1803_v34 = vpop.f32.mrb[1].mxu0 }
  0xf5   :  { %v221_v35 = vpop.f32.mrb[2].mxu0 }
  0xf6   :  { %v1805_v36 = vpop.f32.mrb[3].mxu0  ;;  %v1504_v35 = vunpack.i.h.bf16 %v1502_v20 }
  0xf9   :  { %v226_v38 = vpop.f32.mrb[4].mxu0 }
  0xfa   :  { %v228_v39 = vpop.f32.mrb[5].mxu0 }
  0xfb   :  { %v229_v40 = vadd.f32 %v228_v39, %v130_v37 }
  0xfd   :  { %v1309_v41 = vmul.f32 -1.442695, %v229_v40  ;;  %v232_v42 = vpop.f32.mrb[6].mxu0 }
  0xfe   :  { %v234_v44 = vpop.f32.mrb[7].mxu0 }
  0xff   :  { %1541 = vpow2.f32 %v1309_v41  ;;  %v235_v45 = vadd.f32 %v234_v44, %v135_v43 }
 0x101   :  { %v1312_v46 = vmul.f32 -1.442695, %v235_v45  ;;  %v803_v47 = vpop.f32.mrb[8].mxu0 }
 0x102   :  { %v1807_v48 = vpop.f32.mrb[9].mxu0 }
 0x103   :  { %1543 = vpow2.f32 %v1312_v46 }
 0x105   :  { %v808_v49 = vpop.f32.mrb[10].mxu0 }
 0x106   :  { %v1809_v50 = vpop.f32.mrb[11].mxu0 }
 0x109   :  { %v1542_v52 = vpop.eup %1541  ;;  %v813_v53 = vpop.f32.mrb[12].mxu0 }
 0x10a   :  { %v347_v54 = vadd.f32 1.0, %v1542_v52  ;;  %v815_v55 = vpop.f32.mrb[13].mxu0 }
 0x10b   :  { %v816_v57 = vadd.f32 %v815_v55, %v130_v37 }
 0x10c   :  { %1545 = vrcp.f32 %v347_v54 }
 0x10d   :  { %v1544_v58 = vpop.eup %1543  ;;  %v1341_v59 = vmul.f32 -1.442695, %v816_v57  ;;  %v819_v60 = vpop.f32.mrb[14].mxu0 }
 0x10e   :  { %v350_v61 = vadd.f32 1.0, %v1544_v58  ;;  %v821_v62 = vpop.f32.mrb[15].mxu0 }
 0x10f   :  { %1547 = vpow2.f32 %v1341_v59  ;;  %v822_v0 = vadd.f32 %v821_v62, %v135_v43 }
 0x110   :  { %1549 = vrcp.f32 %v350_v61 }
 0x111   :  { %v1344_v1 = vmul.f32 -1.442695, %v822_v0 }
 0x113   :  { %1551 = vpow2.f32 %v1344_v1 }
 0x116   :  { %v1546_v3 = vpop.eup %1545 }
 0x117   :  { %v371_v4 = vmul.f32 %v1546_v3, %v229_v40 }
 0x119   :  { %v1548_v5 = vpop.eup %1547  ;;  %v379_v6 = vsel %vm100_vm1, %v371_v4, -inf }
 0x11a   :  { %v1550_v7 = vpop.eup %1549  ;;  %v934_v8 = vadd.f32 1.0, %v1548_v5  ;;  %390 = vrot.lane.b32.xlu1 %v379_v6, %s1659_s24 }
 0x11b   :  { %v374_v9 = vmul.f32 %v1550_v7, %v235_v45 }
 0x11c   :  { %1553 = vrcp.f32 %v934_v8 }
 0x11d   :  { %v1552_v10 = vpop.eup %1551  ;;  %v382_v11 = vsel %vm100_vm1, %v374_v9, -inf }
 0x11e   :  { %v937_v12 = vadd.f32 1.0, %v1552_v10  ;;  %392 = vrot.lane.b32.xlu0 %v382_v11, %s1659_s24  ;;  %409 = vrot.lane.b32.xlu1 %v379_v6, %s1660_s25 }
 0x120   :  { %1555 = vrcp.f32 %v937_v12 }
 0x122   :  { %411 = vrot.lane.b32.xlu0 %v382_v11, %s1660_s25  ;;  %1516 = vrot.lane.b32.xlu1 %v1658_v32, %s1660_s25 }
 0x126   :  { %v1554_v14 = vpop.eup %1553  ;;  %1511 = vrot.lane.b32.xlu0 %v1658_v32, %s1659_s24  ;;  %1526 = vrot.lane.b32.xlu1 %v1658_v32, %s1660_s25 }
 0x127   :  { %v958_v15 = vmul.f32 %v1554_v14, %v816_v57 }
 0x129   :  { %v1833_v16 = vsel %vm100_vm1, %v958_v15, -inf }
 0x12a   :  { %v1556_v17 = vpop.eup %1555  ;;  %1521 = vrot.lane.b32.xlu0 %v1658_v32, %s1659_s24  ;;  %977 = vrot.lane.b32.xlu1 %v1833_v16, %s1659_s24 }
 0x12b   :  { %v961_v18 = vmul.f32 %v1556_v17, %v822_v0 }
 0x12d   :  { %v1841_v19 = vsel %vm100_vm1, %v961_v18, -inf }
 0x12e   :  { %979 = vrot.lane.b32.xlu0 %v1841_v19, %s1659_s24  ;;  %995 = vrot.lane.b32.xlu1 %v1833_v16, %s1660_s25 }
 0x132   :  { %997 = vrot.lane.b32.xlu0 %v1841_v19, %s1660_s25  ;;  %1536 = vrot.lane.b32.xlu1 %v1658_v32, %s1660_s25 }
 0x136   :  { %1531 = vrot.lane.b32.xlu0 %v1658_v32, %s1659_s24  ;;  %v1509_v32 = vunpack.i.h.bf16 %v1507_v21 }
 0x18c   :  { %v391_v22 = vpop.permute.xlu1 %390 }
 0x18d   :  { %v401_v27 = vsel %vm398_vm2, %v1503_v23, %v391_v22 }
 0x190   :  { %v393_v25 = vpop.permute.xlu0 %392  ;;  %v410_v26 = vpop.permute.xlu1 %409 }
 0x191   :  { %v418_v29 = vsel %vm417_vm3, %v410_v26, %v1508_v24  ;;  %v402_v40 = vsel %vm398_vm2, %v1504_v35, %v393_v25 }
 0x192   :  { %v425_v33 = vmax.f32 %v401_v27, %v418_v29 }
 0x194   :  { %v431_v37 = vmax.f32 %v379_v6, %v425_v33  ;;  %v412_v38 = vpop.permute.xlu0 %411  ;;  %v1517_v39 = vpop.permute.xlu1 %1516 }
 0x195   :  { %v419_v41 = vsel %vm417_vm3, %v412_v38, %v1509_v32  ;;  %v1519_v42 = vunpack.i.h.bf16 %v1517_v39  ;;  %v1518_v44 = vunpack.i.l.bf16 %v1517_v39 }
 0x196   :  { %v428_v43 = vmax.f32 %v402_v40, %v419_v41  ;;  %v441_v45 = vrot.slane %v431_v37, 1  ;;  %v456_v46 = vrot.slane %v431_v37, 7 }
 0x197   :  { %v421_v52 = vsel %vm417_vm3, %v1519_v42, %v412_v38  ;;  %v423_v53 = vsel %vm417_vm3, %v1509_v32, %v1519_v42  ;;  %v420_v58 = vsel %vm417_vm3, %v1518_v44, %v410_v26  ;;  %v422_v59 = vsel %vm417_vm3, %v1508_v24, %v1518_v44 }
 0x198   :  { %v434_v47 = vmax.f32 %v382_v11, %v428_v43  ;;  %v1512_v49 = vpop.permute.xlu0 %1511  ;;  %v1863_v51 = vpop.permute.xlu1 %1526  ;;  %v469_v8 = vsel %vm455_vm4, -inf, %v456_v46 }
 0x199   :  { %v1514_v54 = vunpack.i.h.bf16 %v1512_v49  ;;  %v1513_v55 = vunpack.i.l.bf16 %v1512_v49  ;;  %v1528_v17 = vunpack.i.l.bf16 %v1863_v51  ;;  %v1529_v38 = vunpack.i.h.bf16 %v1863_v51 }
 0x19a   :  { %v460_v57 = vrot.slane %v434_v47, 7  ;;  %v442_v60 = vrot.slane %v434_v47, 1 }
 0x19b   :  { %v400_v61 = vsel %vm398_vm2, %v393_v25, %v1514_v54  ;;  %v404_v62 = vsel %vm398_vm2, %v1514_v54, %v1504_v35  ;;  %v399_v63 = vsel %vm398_vm2, %v391_v22, %v1513_v55  ;;  %v403_v0 = vsel %vm398_vm2, %v1513_v55, %v1503_v23 }
 0x19c   :  { %v424_v1 = vmax.f32 %v403_v0, %v420_v58  ;;  %v426_v3 = vmax.f32 %v399_v63, %v422_v59  ;;  %v427_v4 = vmax.f32 %v404_v62, %v421_v52  ;;  %v429_v5 = vmax.f32 %v400_v61, %v423_v53  ;;  %v1522_v6 = vpop.permute.xlu0 %1521  ;;  %v978_v7 = vpop.permute.xlu1 %977 }
 0x19d   :  { %v1523_v9 = vunpack.i.l.bf16 %v1522_v6  ;;  %v443_v10 = vsel %vm440_vm5, %v441_v45, %v442_v60  ;;  %v451_v18 = vsel %vm440_vm5, %v442_v60, -inf  ;;  %v461_v26 = vsel %vm455_vm4, %v456_v46, %v460_v57 }
 0x19e   :  { %v457_v11 = vrot.slane %v424_v1, 7  ;;  %v462_v12 = vrot.slane %v426_v3, 7  ;;  %v444_v14 = vrot.slane %v427_v4, 1  ;;  %v458_v15 = vrot.slane %v427_v4, 7 }
 0x19f   :  { %v470_v20 = vmax.f32 %v443_v10, %v469_v8  ;;  %v445_v21 = vrot.slane %v429_v5, 1  ;;  %v463_v27 = vrot.slane %v429_v5, 7  ;;  %v987_v29 = vsel %vm398_vm2, %v1523_v9, %v978_v7 }
 0x1a0   :  { %v980_v22 = vpop.permute.xlu0 %979  ;;  %v996_v23 = vpop.permute.xlu1 %995  ;;  %v450_v24 = vsel %vm440_vm5, %v444_v14, -inf  ;;  %v459_v25 = vsel %vm455_vm4, %v457_v11, %v458_v15  ;;  %v1524_v42 = vunpack.i.h.bf16 %v1522_v6  ;;  %v472_v44 = vmax.f32 %v451_v18, %v461_v26 }
 0x1a1   :  { %v1003_v33 = vsel %vm417_vm3, %v996_v23, %v1528_v17  ;;  %v471_v35 = vmax.f32 %v450_v24, %v459_v25  ;;  %v452_v32 = vsel %vm440_vm5, %v445_v21, -inf  ;;  %v464_v40 = vsel %vm455_vm4, %v462_v12, %v463_v27 }
 0x1a2   :  { %v1010_v39 = vmax.f32 %v987_v29, %v1003_v33  ;;  %v1895_v41 = vmax.f32 %v431_v37, %v470_v20  ;;  %v473_v45 = vmax.f32 %v452_v32, %v464_v40  ;;  %v988_v53 = vsel %vm398_vm2, %v1524_v42, %v980_v22 }
 0x1a3   :  { %v1897_v43 = vmax.f32 %v427_v4, %v471_v35  ;;  %v1908_v57 = vmax.f32 %v434_v47, %v472_v44 }
 0x1a4   :  { %v1016_v46 = vmax.f32 %v1833_v16, %v1010_v39  ;;  %v998_v49 = vpop.permute.xlu0 %997  ;;  %v1537_v52 = vpop.permute.xlu1 %1536  ;;  %v1910_v16 = vmax.f32 %v429_v5, %v473_v45 }
 0x1a5   :  { %v1004_v51 = vsel %vm417_vm3, %v998_v49, %v1529_v38  ;;  %v1539_v54 = vunpack.i.h.bf16 %v1537_v52  ;;  %v1538_v55 = vunpack.i.l.bf16 %v1537_v52  ;;  %488 = vrot.lane.b32.xlu1 %v1897_v43, %s1660_s25  ;;  %479 = vrot.lane.b32.xlu0 %v1897_v43, %s1659_s24  ;;  %v113_v52 = vld [vmem:[#allocation3] sm:$0xff] }
 0x1a6   :  { %v1013_v37 = vmax.f32 %v988_v53, %v1004_v51  ;;  %v1025_v58 = vrot.slane %v1016_v46, 1  ;;  %v1039_v59 = vrot.slane %v1016_v46, 7  ;;  %v114_v53 = vld [vmem:[#allocation3 + $0x8] sm:$0xff] }
 0x1a7   :  { %v1006_v62 = vsel %vm417_vm3, %v1539_v54, %v998_v49  ;;  %v1005_v63 = vsel %vm417_vm3, %v1538_v55, %v996_v23  ;;  %v1007_v3 = vsel %vm417_vm3, %v1528_v17, %v1538_v55  ;;  %v78_v49 = vld [vmem:[%s2130_s4] sm:$0xff]  ;;  %v1450_v51 = vpack.c.bf16 %v114_v53, %v113_v52  ;;  %v116_v55 = vld [vmem:[#allocation3 + $0x18] sm:$0xff] }
 0x1a8   :  { %v1019_v60 = vmax.f32 %v1841_v19, %v1013_v37  ;;  %v1532_v61 = vpop.permute.xlu0 %1531  ;;  %v1008_v19 = vsel %vm417_vm3, %v1529_v38, %v1539_v54  ;;  %v1052_v17 = vsel %vm455_vm4, -inf, %v1039_v59  ;;  %v115_v54 = vld [vmem:[#allocation3 + $0x10] sm:$0xff] }
 0x1a9   :  { %v1534_v0 = vunpack.i.h.bf16 %v1532_v61  ;;  %v1533_v1 = vunpack.i.l.bf16 %v1532_v61  ;;  %481 = vrot.lane.b32.xlu1 %v1908_v57, %s1659_s24  ;;  %483 = vrot.lane.b32.xlu0 %v1910_v16, %s1659_s24  ;;  %v1454_v37 = vpack.c.bf16 %v116_v55, %v115_v54 }
 0x1aa   :  { %v1043_v47 = vrot.slane %v1019_v60, 7  ;;  %v1026_v4 = vrot.slane %v1019_v60, 1  ;;  %1451 = vmatprep.subr.bf16.mxu1 %v1450_v51 }
 0x1ab   :  { %v986_v5 = vsel %vm398_vm2, %v980_v22, %v1534_v0  ;;  %v985_v6 = vsel %vm398_vm2, %v978_v7, %v1533_v1  ;;  %v989_v8 = vsel %vm398_vm2, %v1533_v1, %v1523_v9  ;;  %v990_v10 = vsel %vm398_vm2, %v1534_v0, %v1524_v42  ;;  %1453 = vmatpush3.bf16.msra.mxu1 %v1450_v51 }
 0x1ac   :  { %v1009_v11 = vmax.f32 %v989_v8, %v1005_v63  ;;  %v1011_v12 = vmax.f32 %v985_v6, %v1007_v3  ;;  %v1012_v14 = vmax.f32 %v990_v10, %v1006_v62  ;;  %v1014_v15 = vmax.f32 %v986_v5, %v1008_v19  ;;  %1455 = vmatprep.subr.bf16.mxu1 %v1454_v37 }
 0x1ad   :  { %492 = vrot.lane.b32.xlu1 %v1910_v16, %s1660_s25  ;;  %490 = vrot.lane.b32.xlu0 %v1908_v57, %s1660_s25  ;;  %v1027_v7 = vsel %vm440_vm5, %v1025_v58, %v1026_v4  ;;  %v1035_v27 = vsel %vm440_vm5, %v1026_v4, -inf  ;;  %v1044_v29 = vsel %vm455_vm4, %v1039_v59, %v1043_v47 }
 0x1ae   :  { %v1040_v18 = vrot.slane %v1009_v11, 7  ;;  %v1045_v20 = vrot.slane %v1011_v12, 7  ;;  %v1028_v9 = vrot.slane %v1012_v14, 1  ;;  %v1041_v21 = vrot.slane %v1012_v14, 7 }
 0x1af   :  { %v1053_v22 = vmax.f32 %v1027_v7, %v1052_v17  ;;  %v1029_v23 = vrot.slane %v1014_v15, 1  ;;  %v1046_v24 = vrot.slane %v1014_v15, 7  ;;  %v1055_v40 = vmax.f32 %v1035_v27, %v1044_v29  ;;  %1457 = vmatpush3.bf16.msra.mxu1 %v1454_v37 }
 0x1b0   :  { %v1034_v25 = vsel %vm440_vm5, %v1028_v9, -inf  ;;  %v1042_v26 = vsel %vm455_vm4, %v1040_v18, %v1041_v21 }
 0x1b1   :  { %v1054_v33 = vmax.f32 %v1034_v25, %v1042_v26  ;;  %v1943_v35 = vmax.f32 %v1016_v46, %v1053_v22  ;;  %v1036_v32 = vsel %vm440_vm5, %v1029_v23, -inf  ;;  %v1047_v38 = vsel %vm455_vm4, %v1045_v20, %v1046_v24  ;;  %v79_v46 = vld [vmem:[%s2130_s4 + $0x8] sm:$0xff] }
 0x1b2   :  { %v1056_v42 = vmax.f32 %v1036_v32, %v1047_v38  ;;  %v1953_v44 = vmax.f32 %v1019_v60, %v1055_v40  ;;  %1395 = vmatmul.mubr.msk.f32.vlgmr.msra.gmra.mrb[0].mxu1 %vm137_vm0, %v1773_v28 }
 0x1b3   :  { %v1947_v39 = vmax.f32 %v1012_v14, %v1054_v33  ;;  %1397 = vmatprep.mubr.msk.f32.mxu1 %vm137_vm0, %v1780_v30 }
 0x1b4   :  { %v1955_v45 = vmax.f32 %v1014_v15, %v1056_v42 }
 0x1b5   :  { %1071 = vrot.lane.b32.xlu1 %v1947_v39, %s1660_s25  ;;  %1062 = vrot.lane.b32.xlu0 %v1947_v39, %s1659_s24 }
 0x1b6   :  { %1398 = vmatmul.mubr.msk.f32.gmra.mrb[2].mxu1 %vm137_vm0, %v1787_v31 }
 0x1b9   :  { %1064 = vrot.lane.b32.xlu1 %v1953_v44, %s1659_s24  ;;  %1066 = vrot.lane.b32.xlu0 %v1955_v45, %s1659_s24 }
 0x1bd   :  { %1075 = vrot.lane.b32.xlu1 %v1955_v45, %s1660_s25  ;;  %1073 = vrot.lane.b32.xlu0 %v1953_v44, %s1660_s25 }
 0x1c1   :  { %124 = vperm.xlu1 %1540, %v79_v46   ;;  %119 = vperm.xlu0 %1499, %v78_v49  }
 0x217   :  { %v489_v58 = vpop.permute.xlu1 %488  ;;  %v480_v59 = vpop.permute.xlu0 %479 }
 0x21b   :  { %v482_v60 = vpop.permute.xlu1 %481  ;;  %v484_v61 = vpop.permute.xlu0 %483 }
 0x21c   :  { %v486_v62 = vsel %vm398_vm2, %v480_v59, %v482_v60  ;;  %v485_v63 = vsel %vm398_vm2, %v482_v60, %v484_v61  ;;  %v487_v47 = vsel %vm398_vm2, %v484_v61, %v480_v59 }
 0x21f   :  { %v493_v0 = vpop.permute.xlu1 %492  ;;  %v491_v1 = vpop.permute.xlu0 %490 }
 0x220   :  { %v496_v3 = vsel %vm417_vm3, %v493_v0, %v489_v58  ;;  %v494_v19 = vsel %vm417_vm3, %v491_v1, %v493_v0  ;;  %v495_v4 = vsel %vm417_vm3, %v489_v58, %v491_v1 }
 0x221   :  { %v499_v5 = vmax.f32 %v485_v63, %v496_v3  ;;  %v497_v6 = vmax.f32 %v487_v47, %v495_v4  ;;  %v498_v8 = vmax.f32 %v486_v62, %v494_v19 }
 0x223   :  { %v502_v10 = vmax.f32 %v1910_v16, %v499_v5  ;;  %v500_v11 = vmax.f32 %v1897_v43, %v497_v6  ;;  %v501_v12 = vmax.f32 %v1908_v57, %v498_v8 }
 0x225   :  { %v508_v14 = vrot.slane %v502_v10, 1  ;;  %v517_v15 = vrot.slane %v502_v10, 7  ;;  %v506_v17 = vrot.slane %v500_v11, 1  ;;  %v507_v7 = vrot.slane %v501_v12, 1 }
 0x226   :  { %v515_v18 = vrot.slane %v500_v11, 7  ;;  %v516_v20 = vrot.slane %v501_v12, 7 }
 0x227   :  { %v513_v9 = vsel %vm440_vm5, %v507_v7, -inf  ;;  %v1072_v21 = vpop.permute.xlu1 %1071  ;;  %v1063_v22 = vpop.permute.xlu0 %1062  ;;  %v512_v23 = vsel %vm440_vm5, %v506_v17, -inf  ;;  %v514_v24 = vsel %vm440_vm5, %v508_v14, -inf  ;;  %v523_v16 = vsel %vm455_vm4, -inf, %v517_v15 }
 0x228   :  { %v522_v43 = vsel %vm455_vm4, -inf, %v516_v20  ;;  %v521_v57 = vsel %vm455_vm4, -inf, %v515_v18  ;;  %v526_v27 = vmax.f32 %v514_v24, %v523_v16 }
 0x229   :  { %v524_v25 = vmax.f32 %v512_v23, %v521_v57  ;;  %v525_v26 = vmax.f32 %v513_v9, %v522_v43 }
 0x22a   :  { %v529_v46 = vmax.f32 %v502_v10, %v526_v27 }
 0x22b   :  { %v1065_v29 = vpop.permute.xlu1 %1064  ;;  %v1067_v33 = vpop.permute.xlu0 %1066  ;;  %v527_v32 = vmax.f32 %v500_v11, %v524_v25  ;;  %v1998_v38 = vmax.f32 %v501_v12, %v525_v26 }
 0x22c   :  { %v1069_v49 = vsel %vm398_vm2, %v1063_v22, %v1065_v29  ;;  %v1068_v52 = vsel %vm398_vm2, %v1065_v29, %v1067_v33  ;;  %v1070_v54 = vsel %vm398_vm2, %v1067_v33, %v1063_v22  ;;  %v543_v62 = vrot.slane %v529_v46, 4  ;;  %v82_v33 = vld [vmem:[%s2130_s4 + $0x20] sm:$0xff] }
 0x22d   :  { %v533_v40 = vrot.slane %v527_v32, 4  ;;  %v534_v42 = vrot.slane %v1998_v38, 4  ;;  %530 = vst [vmem:[#allocation2 + $0x18] sm:$0xf] %v1998_v38 }
 0x22f   :  { %537 = vrot.lane.b32.xlu0 %v533_v40, %s1659_s24  ;;  %539 = vrot.lane.b32.xlu1 %v534_v42, %s1659_s24  ;;  %v1076_v53 = vpop.permute.xlu1 %1075  ;;  %v1074_v51 = vpop.permute.xlu0 %1073 }
 0x230   :  { %v1079_v55 = vsel %vm417_vm3, %v1076_v53, %v1072_v21  ;;  %v1077_v37 = vsel %vm417_vm3, %v1074_v51, %v1076_v53  ;;  %v1078_v58 = vsel %vm417_vm3, %v1072_v21, %v1074_v51 }
 0x231   :  { %v1082_v59 = vmax.f32 %v1068_v52, %v1079_v55  ;;  %v1080_v60 = vmax.f32 %v1070_v54, %v1078_v58  ;;  %v1081_v61 = vmax.f32 %v1069_v49, %v1077_v37 }
 0x233   :  { %v1085_v63 = vmax.f32 %v1955_v45, %v1082_v59  ;;  %v1083_v0 = vmax.f32 %v1947_v39, %v1080_v60  ;;  %v1084_v1 = vmax.f32 %v1953_v44, %v1081_v61  ;;  %545 = vrot.lane.b32.xlu0 %v534_v42, %s1660_s25  ;;  %547 = vrot.lane.b32.xlu1 %v543_v62, %s1660_s25 }
 0x235   :  { %v1091_v47 = vrot.slane %v1085_v63, 1  ;;  %v1100_v3 = vrot.slane %v1085_v63, 7  ;;  %v1089_v19 = vrot.slane %v1083_v0, 1  ;;  %v1090_v4 = vrot.slane %v1084_v1, 1 }
 0x236   :  { %v1098_v5 = vrot.slane %v1083_v0, 7  ;;  %v1099_v6 = vrot.slane %v1084_v1, 7 }
 0x237   :  { %v1096_v8 = vsel %vm440_vm5, %v1090_v4, -inf  ;;  %v1095_v10 = vsel %vm440_vm5, %v1089_v19, -inf  ;;  %v1097_v45 = vsel %vm440_vm5, %v1091_v47, -inf  ;;  %v1106_v39 = vsel %vm455_vm4, -inf, %v1100_v3 }
 0x238   :  { %v1105_v44 = vsel %vm455_vm4, -inf, %v1099_v6  ;;  %v1104_v11 = vsel %vm455_vm4, -inf, %v1098_v5  ;;  %v1109_v12 = vmax.f32 %v1097_v45, %v1106_v39 }
 0x239   :  { %v1107_v14 = vmax.f32 %v1095_v10, %v1104_v11  ;;  %v1108_v15 = vmax.f32 %v1096_v8, %v1105_v44 }
 0x23a   :  { %v1112_v18 = vmax.f32 %v1085_v63, %v1109_v12 }
 0x23b   :  { %v1110_v17 = vmax.f32 %v1083_v0, %v1107_v14  ;;  %v2027_v7 = vmax.f32 %v1084_v1, %v1108_v15 }
 0x23c   :  { %v1126_v23 = vrot.slane %v1112_v18, 4 }
 0x23d   :  { %v1116_v20 = vrot.slane %v1110_v17, 4  ;;  %v1117_v9 = vrot.slane %v2027_v7, 4 }
 0x23f   :  { %1120 = vrot.lane.b32.xlu0 %v1116_v20, %s1659_s24  ;;  %1122 = vrot.lane.b32.xlu1 %v1117_v9, %s1659_s24 }
 0x240   :  { %v125_v21 = vpop.permute.xlu1 %124  ;;  %v120_v22 = vpop.permute.xlu0 %119 }
 0x241   :  { %v223_v24 = vadd.f32 %v1805_v36, %v125_v21  ;;  %v810_v16 = vadd.f32 %v1809_v50, %v125_v21  ;;  %v218_v43 = vadd.f32 %v1803_v34, %v120_v22  ;;  %v805_v57 = vadd.f32 %v1807_v48, %v120_v22  ;;  %v83_v36 = vld [vmem:[%s2130_s4 + $0x28] sm:$0xff]  ;;  %v2047_v34 = vld [vmem:[%s2129_s3 + $0x20] sm:$0xff]  ;;  %v84_v48 = vld [vmem:[%s2130_s4 + $0x30] sm:$0xff] }
 0x242   :  { %1408 = vmatprep.mubr.msk.f32.mxu1 %vm137_vm0, %v2047_v34  ;;  %v85_v50 = vld [vmem:[%s2130_s4 + $0x38] sm:$0xff] }
 0x243   :  { %v1307_v25 = vmul.f32 -1.442695, %v223_v24  ;;  %v1339_v26 = vmul.f32 -1.442695, %v810_v16  ;;  %v1306_v27 = vmul.f32 -1.442695, %v218_v43  ;;  %1128 = vrot.lane.b32.xlu0 %v1117_v9, %s1660_s25  ;;  %1130 = vrot.lane.b32.xlu1 %v1126_v23, %s1660_s25 }
 0x244   :  { %v1338_v29 = vmul.f32 -1.442695, %v805_v57 }
 0x245   :  { %1557 = vpow2.f32 %v1307_v25 }
 0x246   :  { %1559 = vpow2.f32 %v1339_v26 }
 0x247   :  { %1561 = vpow2.f32 %v1306_v27  ;;  %575 = vperm.xlu0 %1499, %v82_v33   ;;  %580 = vperm.xlu1 %1540, %v83_v36   ;;  %v733_v27 = vld [vmem:[#allocation3 + $0x20] sm:$0xff] }
 0x248   :  { %1563 = vpow2.f32 %v1338_v29  ;;  %v734_v29 = vld [vmem:[#allocation3 + $0x28] sm:$0xff] }
 0x24b   :  { %585 = vperm.xlu0 %1499, %v84_v48   ;;  %590 = vperm.xlu1 %1540, %v85_v50  }
 0x24f   :  { %v1558_v32 = vpop.eup %1557 }
 0x250   :  { %v1560_v40 = vpop.eup %1559  ;;  %v345_v42 = vadd.f32 1.0, %v1558_v32 }
 0x251   :  { %v1562_v46 = vpop.eup %1561  ;;  %v932_v49 = vadd.f32 1.0, %v1560_v40 }
 0x252   :  { %v1564_v52 = vpop.eup %1563  ;;  %1565 = vrcp.f32 %v345_v42  ;;  %v344_v53 = vadd.f32 1.0, %v1562_v46  ;;  %v1474_v42 = vpack.c.bf16 %v734_v29, %v733_v27 }
 0x253   :  { %1567 = vrcp.f32 %v932_v49  ;;  %v931_v51 = vadd.f32 1.0, %v1564_v52  ;;  %v735_v49 = vld [vmem:[#allocation3 + $0x30] sm:$0xff]  ;;  %v736_v52 = vld [vmem:[#allocation3 + $0x38] sm:$0xff] }
 0x254   :  { %1569 = vrcp.f32 %v344_v53 }
 0x255   :  { %1571 = vrcp.f32 %v931_v51  ;;  %v75_v51 = vld [vmem:[%s2129_s3 + $0x28] sm:$0xff] }
 0x25c   :  { %v1566_v54 = vpop.eup %1565 }
 0x25d   :  { %v1568_v55 = vpop.eup %1567  ;;  %v369_v37 = vmul.f32 %v1566_v54, %v223_v24 }
 0x25e   :  { %v1570_v58 = vpop.eup %1569  ;;  %v956_v59 = vmul.f32 %v1568_v55, %v810_v16 }
 0x25f   :  { %v1572_v60 = vpop.eup %1571  ;;  %v377_v61 = vsel %vm100_vm1, %v369_v37, -inf  ;;  %v368_v62 = vmul.f32 %v1570_v58, %v218_v43  ;;  %v77_v37 = vld [vmem:[%s2129_s3 + $0x38] sm:$0xff] }
 0x260   :  { %v964_v63 = vsel %vm100_vm1, %v956_v59, -inf  ;;  %v955_v0 = vmul.f32 %v1572_v60, %v805_v57 }
 0x261   :  { %v376_v1 = vsel %vm100_vm1, %v368_v62, -inf }
 0x262   :  { %v963_v47 = vsel %vm100_vm1, %v955_v0, -inf  ;;  %v1458_v3 = vpack.c.bf16 %v377_v61, %v376_v1 }
 0x263   :  { %v2065_v19 = vpack.c.bf16 %v964_v63, %v963_v47 }
 0x264   :  { %1459 = vmatprep.subr.bf16.mxu1 %v1458_v3 }
 0x265   :  { %1461 = vmatpush3.bf16.msra.mxu1 %v1458_v3 }
 0x285   :  { %v1396_v43 = vpop.f32.mrb[0].mxu1 }
 0x286   :  { %v303_v25 = vpop.f32.mrb[1].mxu1 }
 0x289   :  { %v1399_v33 = vpop.f32.mrb[2].mxu1 }
 0x28a   :  { %v311_v32 = vpop.f32.mrb[3].mxu1 }
 0x2a1   :  { %v540_v4 = vpop.permute.xlu1 %539  ;;  %v538_v5 = vpop.permute.xlu0 %537 }
 0x2a2   :  { %v541_v10 = vsel %vm398_vm2, %v538_v5, %v540_v4 }
 0x2a5   :  { %v548_v6 = vpop.permute.xlu1 %547  ;;  %v546_v8 = vpop.permute.xlu0 %545 }
 0x2a6   :  { %v549_v45 = vsel %vm417_vm3, %v546_v8, %v548_v6 }
 0x2a7   :  { %v550_v39 = vmax.f32 %v541_v10, %v549_v45 }
 0x2a9   :  { %v552_v44 = vrot.slane %v550_v39, 4 }
 0x2ab   :  { %v554_v2 = vmax.f32 %v1998_v38, %v552_v44 }
 0x2ad   :  { %v556_v11 = vrot.slane %v554_v2, 5  ;;  %v560_v12 = vrot.slane %v554_v2, 3 }
 0x2af   :  { %v559_v14 = vsel %vm558_vm6, %v556_v11, -inf  ;;  %v562_v15 = vsel %vm455_vm4, -inf, %v560_v12 }
 0x2b0   :  { %v563_v17 = vmax.f32 %v559_v14, %v562_v15 }
 0x2b1   :  { %v1123_v18 = vpop.permute.xlu1 %1122  ;;  %v1121_v20 = vpop.permute.xlu0 %1120 }
 0x2b2   :  { %v565_v9 = vrot.slane %v563_v17, 4  ;;  %v1124_v24 = vsel %vm398_vm2, %v1121_v20, %v1123_v18 }
 0x2b4   :  { %v567_v21 = vmax.f32 %v554_v2, %v565_v9 }
 0x2b5   :  { %v1131_v22 = vpop.permute.xlu1 %1130  ;;  %v1129_v23 = vpop.permute.xlu0 %1128 }
 0x2b6   :  { %568 = vst [vmem:[#allocation2 + $0x18] sm:$0xf0] %v567_v21  ;;  %v1132_v38 = vsel %vm417_vm3, %v1129_v23, %v1131_v22 }
 0x2b7   :  { %v1133_v16 = vmax.f32 %v1124_v24, %v1132_v38 }
 0x2b9   :  { %v1135_v57 = vrot.slane %v1133_v16, 4 }
 0x2bb   :  { %v1137_v26 = vmax.f32 %v2027_v7, %v1135_v57 }
 0x2bd   :  { %v1139_v36 = vrot.slane %v1137_v26, 5  ;;  %v1142_v48 = vrot.slane %v1137_v26, 3  ;;  %v572_v50 = vld [vmem:[#allocation2 + $0x18] sm:$0xff] }
 0x2be   :  { %v1462_v40 = vpack.c.bf16 %v572_v50, %v1895_v41  ;;  %1113 = vst [vmem:[#allocation2 + $0x18] sm:$0xf] %v2027_v7  ;;  %v76_v41 = vld [vmem:[%s2129_s3 + $0x30] sm:$0xff]  ;;  %v1478_v7 = vpack.c.bf16 %v736_v52, %v735_v49  ;;  %s1661_s3 = smov [#allocation6]  }
 0x2bf   :  { %v1141_v56 = vsel %vm558_vm6, %v1139_v36, -inf  ;;  %v1144_v46 = vsel %vm455_vm4, -inf, %v1142_v48  ;;  %s1278_s20 = sshll.u32 %s1661_s3, 4  ;;  %s1279_s20 = int_to_ptr.vmem [resolvable:$true] %s1278_s20 }
 0x2c0   :  { %v1145_v53 = vmax.f32 %v1141_v56, %v1144_v46  ;;  %1463 = vmatprep.subr.bf16.mxu1 %v1462_v40  ;;  %s1627_s21 = scalar_lea.vmem %s1279_s20, 1024  ;;  %p1632_p9 = scmp.lt.s32.totalorder %s1279_s20, %s1279_s20 }
 0x2c1   :  { %1465 = vmatpush3.bf16.msra.mxu1 %v1462_v40  ;;  %p1628_p8 = scmp.ne.s32.totalorder %s1279_s20, %s1627_s21  ;;  %p1633_p10 = scmp.lt.s32.totalorder %s1627_s21, %s1627_s21 }
 0x2c2   :  { %v1147_v54 = vrot.slane %v1145_v53, 4  ;;  %1475 = vmatprep.subr.bf16.mxu1 %v1474_v42 }
 0x2c3   :  { %p1634_p11 = por %p1633_p10, %p1632_p9 }
 0x2c4   :  { %v1149_v55 = vmax.f32 %v1137_v26, %v1147_v54  ;;  %1409 = vmatmul.mubr.msk.f32.vlgmr.msra.gmra.mrb[4].mxu1 %vm137_vm0, %v75_v51 }
 0x2c5   :  { %1477 = vmatpush3.bf16.msra.mxu1 %v1474_v42  ;;  %1411 = vmatprep.mubr.msk.f32.mxu1 %vm137_vm0, %v76_v41  ;;  %p1635_p12 = pnand %p1634_p11, %p1628_p8 }
 0x2c6   :  { %1150 = vst [vmem:[#allocation2 + $0x18] sm:$0xf0] %v1149_v55  ;;  %1479 = vmatprep.subr.bf16.mxu1 %v1478_v7 }
 0x2c8   :  { %1412 = vmatmul.mubr.msk.f32.gmra.mrb[6].mxu1 %vm137_vm0, %v77_v37 }
 0x2c9   :  { %1481 = vmatpush3.bf16.msra.mxu1 %v1478_v7  ;;  %1422 = vmatprep.mubr.msk.f32.mxu1 %vm137_vm0, %v1734_v13  ;;  %v581_v13 = vpop.permute.xlu1 %580 }
 0x2ca   :  { %1483 = vmatprep.subr.bf16.mxu1 %v2065_v19 }
 0x2cc   :  { %1423 = vmatmul.mubr.msk.f32.vlgmr.msra.gmra.mrb[8].mxu1 %vm137_vm0, %v1773_v28  ;;  %v576_v28 = vpop.permute.xlu0 %575 }
 0x2cd   :  { %1485 = vmatpush3.bf16.msra.mxu1 %v2065_v19  ;;  %1425 = vmatprep.mubr.msk.f32.mxu1 %vm137_vm0, %v1780_v30  ;;  %v1154_v58 = vld [vmem:[#allocation2 + $0x18] sm:$0xff]  ;;  %v591_v63 = vpop.permute.xlu1 %590 }
 0x2ce   :  { %v1486_v59 = vpack.c.bf16 %v1154_v58, %v1943_v35 }
 0x2d0   :  { %1426 = vmatmul.mubr.msk.f32.gmra.mrb[10].mxu1 %vm137_vm0, %v1787_v31  ;;  %1487 = vmatprep.subr.bf16.mxu1 %v1486_v59  ;;  %v586_v1 = vpop.permute.xlu0 %585 }
 0x2d1   :  { %1489 = vmatpush3.bf16.msra.mxu1 %v1486_v59  ;;  %1436 = vmatprep.mubr.msk.f32.mxu1 %vm137_vm0, %v2047_v34 }
 0x2d4   :  { %1437 = vmatmul.mubr.msk.f32.vlgmr.msra.gmra.mrb[12].mxu1 %vm137_vm0, %v75_v51 }
 0x2d5   :  { %1439 = vmatprep.mubr.msk.f32.mxu1 %vm137_vm0, %v76_v41 }
 0x2d8   :  { %1440 = vmatmul.mubr.msk.f32.gmra.mrb[14].mxu1 %vm137_vm0, %v77_v37 }
 0x397   :  { %v1410_v30 = vpop.f32.mrb[4].mxu1 }
 0x398   :  { %v677_v60 = vadd.f32 %v1410_v30, %v581_v13  ;;  %v671_v61 = vpop.f32.mrb[5].mxu1 }
 0x399   :  { %v672_v35 = vadd.f32 %v671_v61, %v576_v28 }
 0x39a   :  { %v1319_v62 = vmul.f32 -1.442695, %v677_v60 }
 0x39b   :  { %v1318_v31 = vmul.f32 -1.442695, %v672_v35  ;;  %v1413_v0 = vpop.f32.mrb[6].mxu1 }
 0x39c   :  { %1573 = vpow2.f32 %v1319_v62  ;;  %v687_v47 = vadd.f32 %v1413_v0, %v591_v63  ;;  %v681_v34 = vpop.f32.mrb[7].mxu1 }
 0x39d   :  { %1575 = vpow2.f32 %v1318_v31  ;;  %v682_v3 = vadd.f32 %v681_v34, %v586_v1 }
 0x39e   :  { %v1321_v19 = vmul.f32 -1.442695, %v687_v47 }
 0x39f   :  { %v1320_v4 = vmul.f32 -1.442695, %v682_v3  ;;  %v1424_v5 = vpop.f32.mrb[8].mxu1 }
 0x3a0   :  { %1577 = vpow2.f32 %v1321_v19  ;;  %v890_v6 = vpop.f32.mrb[9].mxu1 }
 0x3a1   :  { %1579 = vpow2.f32 %v1320_v4 }
 0x3a3   :  { %v1427_v8 = vpop.f32.mrb[10].mxu1 }
 0x3a4   :  { %v898_v10 = vpop.f32.mrb[11].mxu1 }
 0x3a6   :  { %v1574_v45 = vpop.eup %1573 }
 0x3a7   :  { %v1576_v39 = vpop.eup %1575  ;;  %v703_v44 = vadd.f32 1.0, %v1574_v45  ;;  %v1438_v2 = vpop.f32.mrb[12].mxu1 }
 0x3a8   :  { %v702_v11 = vadd.f32 1.0, %v1576_v39  ;;  %v1227_v12 = vadd.f32 %v1438_v2, %v581_v13  ;;  %v1221_v14 = vpop.f32.mrb[13].mxu1 }
 0x3a9   :  { %1581 = vrcp.f32 %v703_v44  ;;  %v1222_v15 = vadd.f32 %v1221_v14, %v576_v28 }
 0x3aa   :  { %v1578_v17 = vpop.eup %1577  ;;  %1583 = vrcp.f32 %v702_v11  ;;  %v1351_v18 = vmul.f32 -1.442695, %v1227_v12 }
 0x3ab   :  { %v1580_v20 = vpop.eup %1579  ;;  %v705_v9 = vadd.f32 1.0, %v1578_v17  ;;  %v1350_v21 = vmul.f32 -1.442695, %v1222_v15  ;;  %v1441_v22 = vpop.f32.mrb[14].mxu1 }
 0x3ac   :  { %v704_v23 = vadd.f32 1.0, %v1580_v20  ;;  %1585 = vpow2.f32 %v1351_v18  ;;  %v1237_v24 = vadd.f32 %v1441_v22, %v591_v63  ;;  %v1231_v38 = vpop.f32.mrb[15].mxu1 }
 0x3ad   :  { %1587 = vrcp.f32 %v705_v9  ;;  %v1232_v16 = vadd.f32 %v1231_v38, %v586_v1 }
 0x3ae   :  { %1589 = vrcp.f32 %v704_v23  ;;  %v1353_v43 = vmul.f32 -1.442695, %v1237_v24 }
 0x3af   :  { %1591 = vpow2.f32 %v1350_v21  ;;  %v1352_v57 = vmul.f32 -1.442695, %v1232_v16 }
 0x3b0   :  { %1593 = vpow2.f32 %v1353_v43 }
 0x3b1   :  { %1595 = vpow2.f32 %v1352_v57 }
 0x3b3   :  { %v1582_v25 = vpop.eup %1581 }
 0x3b4   :  { %v1584_v26 = vpop.eup %1583  ;;  %v715_v27 = vmul.f32 %v1582_v25, %v677_v60 }
 0x3b5   :  { %v714_v29 = vmul.f32 %v1584_v26, %v672_v35 }
 0x3b6   :  { %v1586_v33 = vpop.eup %1585  ;;  %719 = vst [vmem:[#allocation6 + $0x8] sm:$0xff] %v715_v27 }
 0x3b7   :  { %v1588_v36 = vpop.eup %1587  ;;  %718 = vst [vmem:[#allocation6] sm:$0xff] %v714_v29  ;;  %v1253_v48 = vadd.f32 1.0, %v1586_v33 }
 0x3b8   :  { %v1590_v50 = vpop.eup %1589  ;;  %v717_v32 = vmul.f32 %v1588_v36, %v687_v47 }
 0x3b9   :  { %v1592_v40 = vpop.eup %1591  ;;  %v716_v42 = vmul.f32 %v1590_v50, %v682_v3  ;;  %1597 = vrcp.f32 %v1253_v48 }
 0x3ba   :  { %v1594_v56 = vpop.eup %1593  ;;  %721 = vst [vmem:[#allocation6 + $0x18] sm:$0xff] %v717_v32  ;;  %v1252_v46 = vadd.f32 1.0, %v1592_v40 }
 0x3bb   :  { %v1596_v49 = vpop.eup %1595  ;;  %720 = vst [vmem:[#allocation6 + $0x10] sm:$0xff] %v716_v42  ;;  %v1255_v52 = vadd.f32 1.0, %v1594_v56 }
 0x3bc   :  { %1599 = vrcp.f32 %v1252_v46  ;;  %v1254_v53 = vadd.f32 1.0, %v1596_v49 }
 0x3bd   :  { %1601 = vrcp.f32 %v1255_v52 }
 0x3be   :  { %1603 = vrcp.f32 %v1254_v53 }
 0x3c3   :  { %v1598_v51 = vpop.eup %1597 }
 0x3c4   :  { %v1265_v54 = vmul.f32 %v1598_v51, %v1227_v12 }
 0x3c6   :  { %v1600_v41 = vpop.eup %1599  ;;  %1270 = vst [vmem:[#allocation6 + $0x28] sm:$0xff] %v1265_v54 }
 0x3c7   :  { %v1602_v7 = vpop.eup %1601  ;;  %v1264_v55 = vmul.f32 %v1600_v41, %v1222_v15 }
 0x3c8   :  { %v1604_v37 = vpop.eup %1603  ;;  %v1267_v58 = vmul.f32 %v1602_v7, %v1237_v24 }
 0x3c9   :  { %1269 = vst [vmem:[#allocation6 + $0x20] sm:$0xff] %v1264_v55  ;;  %v1266_v59 = vmul.f32 %v1604_v37, %v1232_v16 }
 0x3ca   :  { %1272 = vst [vmem:[#allocation6 + $0x38] sm:$0xff] %v1267_v58 }
 0x3cb   :  { %1271 = vst [vmem:[#allocation6 + $0x30] sm:$0xff] %v1266_v59 }
 0x3cc   :  { %1638 = shalt.err (!%p1635_p12)
}
 0x3cd   :  { %s1639_s23 = scalar_lea.hbm %s2131_s5, 1024 }
 0x3ce   :  { %p1640_p13 = scmp.ne.s32.totalorder %s2131_s5, %s1639_s23  ;;  %p1643_p0 = scmp.lt.u32.totalorder %s1639_s23, %s2131_s5 }
 0x3d0   :  { %p1645_p1 = pnand %p1643_p0, %p1640_p13 }
 0x3d2   :  { %1648 = shalt.err (!%p1645_p1)
}
 0x3d3   :  { %1284 = dma.vmem_to_hbm [thread:$0]  %s1279_s20, 1024, %s2131_s5, [#allocation5], %s1654_s28, %s1654_s28, %s1655_s29  }
 0x3d4   :  { %1651 = dma.done.wait [#allocation5], 1024  }
 0x3d5   :  { %1652 = vsyncadd [#allocation5], 4294966272 }
 0x3d6   :  { %1288 = vsyncpa [#allocation4], 1 }
 0x3d7   :  { %1289 = vsyncpa [#allocation5], 1 }

</bundles_post_ra>
